<compile_context>
chip_gen: v5e
topology: v5e:2x2
jax: 0.10.0
libtpu: 0.0.40
codegen_flags: <defaults>
</compile_context>

<pallas_src>
import functools

import jax
import jax.numpy as jnp
from jax import lax
from jax.experimental import pallas as pl
from jax.experimental.pallas import tpu as pltpu


def _downsampling_block_kernel(x_ref, w_ref, p_ref, o_ref, conv_ref, sum_ref, *,
                               n_batch, c_in, k, dilation, l_pool, l_out, eps):
    """Per grid step (one batch): pool -> dilated conv (VPU, f32); finalize: BN+ReLU."""
    b = pl.program_id(0)
    c_out = w_ref.shape[0]

    @pl.when(b == 0)
    def _init():
        sum_ref[...] = jnp.zeros_like(sum_ref)

    # ---- AvgPool1d(kernel=3, stride=2) from even/odd phase planes (lane-dense) ----
    xe = x_ref[0, 0]                                    # (c_in, l_half): x[..., 0::2]
    xo = x_ref[0, 1]                                    # (c_in, l_half): x[..., 1::2]
    pooled = (xe[:, :l_pool] + xo[:, :l_pool] + xe[:, 1:l_pool + 1]) * (1.0 / 3.0)

    # ---- Dilated Conv1d: k*c_in broadcast FMAs on the VPU (exact f32) ----
    # Contraction depth k*c_in (=12) is far below MXU width, so the MXU / im2col
    # path would be <5% utilized; lane-dense VPU FMAs are exact and scratch-free.
    acc = jnp.zeros((c_out, l_out), jnp.float32)
    for j in range(k):                                  # static, tiny (kernel taps)
        lo = j * dilation
        for c in range(c_in):
            w_col = w_ref[:, j * c_in + c:j * c_in + c + 1]     # (c_out, 1)
            tap = pooled[c:c + 1, lo:lo + l_out]                # (1, l_out)
            acc = acc + w_col * tap                             # (c_out, l_out)
    # Note: the conv bias cancels exactly under training-mode BN (mean subtraction).

    conv_ref[b] = acc                                   # lane-dense store to scratch
    sum_ref[...] += jnp.sum(acc, axis=1, keepdims=True)  # per-channel running sum

    # ---- Finalize: BatchNorm1d (training-mode batch stats, biased var) + ReLU ----
    @pl.when(b == n_batch - 1)
    def _finalize():
        inv_cnt = 1.0 / float(n_batch * l_out)
        mean = sum_ref[...] * inv_cnt                   # (c_out, 1)
        convall = conv_ref[...]                         # (n, c_out, l_out), resident
        diff = convall - mean[None, :, :]               # centered => two-pass variance
        var = jnp.sum(jnp.sum(diff * diff, axis=2, keepdims=True),
                      axis=0, keepdims=True) * inv_cnt  # (1, c_out, 1)
        var = jnp.maximum(var, 0.0)                     # defensive; >= 0 by construction
        gamma = p_ref[:, 1:2][None, :, :]               # (1, c_out, 1)
        beta = p_ref[:, 2:3][None, :, :]
        scale = gamma * lax.rsqrt(var + eps)            # EUP rsqrt
        o_ref[...] = jnp.maximum(diff * scale + beta, 0.0).astype(o_ref.dtype)


def downsampling_block(x_ncl, conv_weight, conv_bias, bn_gamma, bn_beta, *,
                       dilation):
    """x_ncl: (N, C_in, L) f32; conv_weight: (C_out, C_in, K) (PyTorch layout)."""
    n, c_in, l_in = x_ncl.shape
    c_out, c_in_w, k = conv_weight.shape
    assert c_in_w == c_in
    l_pool = (l_in - 3) // 2 + 1
    l_out = l_pool - dilation * (k - 1)
    assert l_out > 0, "sequence too short for this pool/conv configuration"

    x = x_ncl.astype(jnp.float32)
    if l_in % 2:                       # pad so the phase split is rectangular
        x = jnp.pad(x, ((0, 0), (0, 0), (0, 1)))
    l_half = x.shape[-1] // 2
    assert l_half >= l_pool + 1

    # Even/odd phase split (wrapper-side layout plumbing, one strided XLA copy):
    # the in-kernel stride-2 decimation becomes contiguous lane-aligned adds.
    x_ph = x.reshape(n, c_in, l_half, 2).transpose(0, 3, 1, 2)   # (n, 2, c_in, l_half)

    # Weight as a single lane-dense (c_out, k*c_in) tile, column index = j*c_in + c.
    w_mat = jnp.transpose(conv_weight, (0, 2, 1)).reshape(c_out, k * c_in)
    w_mat = w_mat.astype(jnp.float32)
    # Per-channel parameters packed into one (c_out, 3) tile: [bias, gamma, beta].
    params = jnp.stack([conv_bias, bn_gamma, bn_beta], axis=1).astype(jnp.float32)

    kernel = functools.partial(
        _downsampling_block_kernel, n_batch=n, c_in=c_in, k=k, dilation=dilation,
        l_pool=l_pool, l_out=l_out, eps=1e-5)

    out = pl.pallas_call(
        kernel,
        out_shape=jax.ShapeDtypeStruct((n, c_out, l_out), jnp.float32),
        grid=(n,),
        in_specs=[pl.BlockSpec((1, 2, c_in, l_half), lambda b: (b, 0, 0, 0)),
                  pl.BlockSpec((c_out, k * c_in), lambda b: (0, 0)),
                  pl.BlockSpec((c_out, 3), lambda b: (0, 0))],
        out_specs=pl.BlockSpec((n, c_out, l_out), lambda b: (0, 0, 0)),
        scratch_shapes=[pltpu.VMEM((n, c_out, l_out), jnp.float32),
                        pltpu.VMEM((c_out, 1), jnp.float32)],
        compiler_params=pltpu.CompilerParams(
            # Sequential over batch: global BN stats accumulate in scratch and the
            # full output is written once at the final step (accumulator pattern).
            dimension_semantics=("arbitrary",),
            vmem_limit_bytes=32 * 1024 * 1024),
    )(x_ph, w_mat, params)
    return out


def _reference(x, conv_weight, conv_bias, bn_gamma, bn_beta, *, dilation):
    """Pure-JAX f32 reference of the PyTorch forward (training-mode BN)."""
    n, c_in, l_in = x.shape
    c_out, _, k = conv_weight.shape
    l_pool = (l_in - 3) // 2 + 1
    l_out = l_pool - dilation * (k - 1)
    idx = 2 * jnp.arange(l_pool)
    x_pool = (x[:, :, idx] + x[:, :, idx + 1] + x[:, :, idx + 2]) * (1.0 / 3.0)
    out = jnp.zeros((n, c_out, l_out), jnp.float32)
    for j in range(k):
        xj = x_pool[:, :, j * dilation:j * dilation + l_out]
        wj = conv_weight[:, :, j]
        out = out + jnp.einsum('ncl,oc->nol', xj, wj,
                               precision=lax.Precision.HIGHEST)
    out = out + conv_bias[None, :, None]
    mean = out.mean(axis=(0, 2), keepdims=True)
    var = ((out - mean) ** 2).mean(axis=(0, 2), keepdims=True)
    y = (out - mean) / jnp.sqrt(var + 1e-5)
    y = y * bn_gamma[None, :, None] + bn_beta[None, :, None]
    return jnp.maximum(y, 0.0)


if __name__ == "__main__":
    # Module hyper-params (SMALL, consistent with the nn.Module __init__).
    in_channels, out_channels, kernel_size, dilation = 4, 8, 3, 2
    batch, seq_len = 2, 64

    key = jax.random.PRNGKey(0)
    kx, kw, kb, kg, kbt = jax.random.split(key, 5)

    x = jax.random.normal(kx, (batch, in_channels, seq_len), jnp.float32)
    fan_in = in_channels * kernel_size
    conv_weight = jax.random.normal(kw, (out_channels, in_channels, kernel_size),
                                    jnp.float32) / jnp.sqrt(float(fan_in))
    conv_bias = 0.1 * jax.random.normal(kb, (out_channels,), jnp.float32)
    bn_gamma = 1.0 + 0.1 * jax.random.normal(kg, (out_channels,), jnp.float32)
    bn_beta = 0.05 * jax.random.normal(kbt, (out_channels,), jnp.float32)

    out = downsampling_block(x, conv_weight, conv_bias, bn_gamma, bn_beta,
                             dilation=dilation)
    out = jax.block_until_ready(out)

    expected_lout = ((seq_len - 3) // 2 + 1) - dilation * (kernel_size - 1)
    assert out.shape == (batch, out_channels, expected_lout), out.shape

    # Tight check vs the full-f32 PyTorch-style forward (kernel is exact f32 now).
    ref = _reference(x, conv_weight, conv_bias, bn_gamma, bn_beta,
                     dilation=dilation)
    max_err = float(jnp.max(jnp.abs(out - ref)))
    assert jnp.allclose(out, ref, atol=1e-3, rtol=1e-3), max_err

    print("KERNEL_OK")
</pallas_src>

<mosaic_0001>
module attributes {stable_mosaic.version = 11 : i64} {
  func.func @_downsampling_block_kernel(%arg0: i32, %arg1: memref<1x2x4x32xf32, #tpu.memory_space<vmem>>, %arg2: memref<8x12xf32, #tpu.memory_space<vmem>>, %arg3: memref<8x3xf32, #tpu.memory_space<vmem>>, %arg4: memref<2x8x27xf32, #tpu.memory_space<vmem>>, %arg5: memref<2x8x27xf32, #tpu.memory_space<vmem>>, %arg6: memref<8x1xf32, #tpu.memory_space<vmem>>) attributes {dimension_semantics = [#tpu.dimension_semantics<arbitrary>], iteration_bounds = array<i64: 2>, scalar_prefetch = 0 : i64, scratch_operands = 2 : i64, tpu.core_type = #tpu.core_type<tc>, window_params = [{transform_indices = @transform_0, window_bounds = array<i64: 1, 2, 4, 32>}, {pipeline_mode = #tpu.pipeline_mode<synchronous>, transform_indices = @transform_1, window_bounds = array<i64: 8, 12>}, {pipeline_mode = #tpu.pipeline_mode<synchronous>, transform_indices = @transform_2, window_bounds = array<i64: 8, 3>}, {pipeline_mode = #tpu.pipeline_mode<synchronous>, transform_indices = @transform_3, window_bounds = array<i64: 2, 8, 27>}]} {
    %c0_i32 = arith.constant 0 : i32
    %0 = arith.cmpi eq, %arg0, %c0_i32 : i32
    %1 = arith.extui %0 : i1 to i32
    %c0_i32_0 = arith.constant 0 : i32
    %2 = arith.cmpi ne, %1, %c0_i32_0 : i32
    scf.if %2 {
      %cst_30 = arith.constant 0.000000e+00 : f32
      %99 = vector.broadcast %cst_30 : f32 to vector<8x1xf32>
      %c0_31 = arith.constant 0 : index
      %c0_32 = arith.constant 0 : index
      %100 = vector.load %arg6[%c0_31, %c0_32] : memref<8x1xf32, #tpu.memory_space<vmem>>, vector<8x1xf32>
      tpu.vector_store %arg6[%c0_31, %c0_32], %99 {strides = array<i32>} : memref<8x1xf32, #tpu.memory_space<vmem>>, vector<8x1xf32>,
    } else {
    }
    %c0 = arith.constant 0 : index
    %c0_1 = arith.constant 0 : index
    %c0_2 = arith.constant 0 : index
    %c0_3 = arith.constant 0 : index
    %3 = vector.load %arg1[%c0, %c0_1, %c0_2, %c0_3] : memref<1x2x4x32xf32, #tpu.memory_space<vmem>>, vector<1x1x4x32xf32>
    %4 = vector.shape_cast %3 : vector<1x1x4x32xf32> to vector<4x32xf32>
    %c0_4 = arith.constant 0 : index
    %c1 = arith.constant 1 : index
    %c0_5 = arith.constant 0 : index
    %c0_6 = arith.constant 0 : index
    %5 = vector.load %arg1[%c0_4, %c1, %c0_5, %c0_6] : memref<1x2x4x32xf32, #tpu.memory_space<vmem>>, vector<1x1x4x32xf32>
    %6 = vector.shape_cast %5 : vector<1x1x4x32xf32> to vector<4x32xf32>
    %7 = vector.extract_strided_slice %4 {offsets = [0, 0], sizes = [4, 31], strides = [1, 1]} : vector<4x32xf32> to vector<4x31xf32>
    %8 = vector.extract_strided_slice %6 {offsets = [0, 0], sizes = [4, 31], strides = [1, 1]} : vector<4x32xf32> to vector<4x31xf32>
    %9 = arith.addf %7, %8 : vector<4x31xf32>
    %10 = vector.extract_strided_slice %4 {offsets = [0, 1], sizes = [4, 31], strides = [1, 1]} : vector<4x32xf32> to vector<4x31xf32>
    %11 = arith.addf %9, %10 : vector<4x31xf32>
    %cst = arith.constant 0.333333343 : f32
    %12 = vector.broadcast %cst : f32 to vector<4x31xf32>
    %13 = arith.mulf %11, %12 : vector<4x31xf32>
    %cst_7 = arith.constant 0.000000e+00 : f32
    %14 = vector.broadcast %cst_7 : f32 to vector<8x27xf32>
    %c0_8 = arith.constant 0 : index
    %c0_9 = arith.constant 0 : index
    %15 = vector.load %arg2[%c0_8, %c0_9] : memref<8x12xf32, #tpu.memory_space<vmem>>, vector<8x1xf32>
    %16 = vector.extract_strided_slice %13 {offsets = [0, 0], sizes = [1, 27], strides = [1, 1]} : vector<4x31xf32> to vector<1x27xf32>
    %17 = vector.broadcast %15 : vector<8x1xf32> to vector<8x27xf32>
    %18 = vector.broadcast %16 : vector<1x27xf32> to vector<8x27xf32>
    %19 = arith.mulf %17, %18 : vector<8x27xf32>
    %20 = arith.addf %14, %19 : vector<8x27xf32>
    %c0_10 = arith.constant 0 : index
    %c1_11 = arith.constant 1 : index
    %21 = vector.load %arg2[%c0_10, %c1_11] : memref<8x12xf32, #tpu.memory_space<vmem>>, vector<8x1xf32>
    %22 = vector.extract_strided_slice %13 {offsets = [1, 0], sizes = [1, 27], strides = [1, 1]} : vector<4x31xf32> to vector<1x27xf32>
    %23 = vector.broadcast %21 : vector<8x1xf32> to vector<8x27xf32>
    %24 = vector.broadcast %22 : vector<1x27xf32> to vector<8x27xf32>
    %25 = arith.mulf %23, %24 : vector<8x27xf32>
    %26 = arith.addf %20, %25 : vector<8x27xf32>
    %c0_12 = arith.constant 0 : index
    %c2 = arith.constant 2 : index
    %27 = vector.load %arg2[%c0_12, %c2] : memref<8x12xf32, #tpu.memory_space<vmem>>, vector<8x1xf32>
    %28 = vector.extract_strided_slice %13 {offsets = [2, 0], sizes = [1, 27], strides = [1, 1]} : vector<4x31xf32> to vector<1x27xf32>
    %29 = vector.broadcast %27 : vector<8x1xf32> to vector<8x27xf32>
    %30 = vector.broadcast %28 : vector<1x27xf32> to vector<8x27xf32>
    %31 = arith.mulf %29, %30 : vector<8x27xf32>
    %32 = arith.addf %26, %31 : vector<8x27xf32>
    %c0_13 = arith.constant 0 : index
    %c3 = arith.constant 3 : index
    %33 = vector.load %arg2[%c0_13, %c3] : memref<8x12xf32, #tpu.memory_space<vmem>>, vector<8x1xf32>
    %34 = vector.extract_strided_slice %13 {offsets = [3, 0], sizes = [1, 27], strides = [1, 1]} : vector<4x31xf32> to vector<1x27xf32>
    %35 = vector.broadcast %33 : vector<8x1xf32> to vector<8x27xf32>
    %36 = vector.broadcast %34 : vector<1x27xf32> to vector<8x27xf32>
    %37 = arith.mulf %35, %36 : vector<8x27xf32>
    %38 = arith.addf %32, %37 : vector<8x27xf32>
    %c0_14 = arith.constant 0 : index
    %c4 = arith.constant 4 : index
    %39 = vector.load %arg2[%c0_14, %c4] : memref<8x12xf32, #tpu.memory_space<vmem>>, vector<8x1xf32>
    %40 = vector.extract_strided_slice %13 {offsets = [0, 2], sizes = [1, 27], strides = [1, 1]} : vector<4x31xf32> to vector<1x27xf32>
    %41 = vector.broadcast %39 : vector<8x1xf32> to vector<8x27xf32>
    %42 = vector.broadcast %40 : vector<1x27xf32> to vector<8x27xf32>
    %43 = arith.mulf %41, %42 : vector<8x27xf32>
    %44 = arith.addf %38, %43 : vector<8x27xf32>
    %c0_15 = arith.constant 0 : index
    %c5 = arith.constant 5 : index
    %45 = vector.load %arg2[%c0_15, %c5] : memref<8x12xf32, #tpu.memory_space<vmem>>, vector<8x1xf32>
    %46 = vector.extract_strided_slice %13 {offsets = [1, 2], sizes = [1, 27], strides = [1, 1]} : vector<4x31xf32> to vector<1x27xf32>
    %47 = vector.broadcast %45 : vector<8x1xf32> to vector<8x27xf32>
    %48 = vector.broadcast %46 : vector<1x27xf32> to vector<8x27xf32>
    %49 = arith.mulf %47, %48 : vector<8x27xf32>
    %50 = arith.addf %44, %49 : vector<8x27xf32>
    %c0_16 = arith.constant 0 : index
    %c6 = arith.constant 6 : index
    %51 = vector.load %arg2[%c0_16, %c6] : memref<8x12xf32, #tpu.memory_space<vmem>>, vector<8x1xf32>
    %52 = vector.extract_strided_slice %13 {offsets = [2, 2], sizes = [1, 27], strides = [1, 1]} : vector<4x31xf32> to vector<1x27xf32>
    %53 = vector.broadcast %51 : vector<8x1xf32> to vector<8x27xf32>
    %54 = vector.broadcast %52 : vector<1x27xf32> to vector<8x27xf32>
    %55 = arith.mulf %53, %54 : vector<8x27xf32>
    %56 = arith.addf %50, %55 : vector<8x27xf32>
    %c0_17 = arith.constant 0 : index
    %c7 = arith.constant 7 : index
    %57 = vector.load %arg2[%c0_17, %c7] : memref<8x12xf32, #tpu.memory_space<vmem>>, vector<8x1xf32>
    %58 = vector.extract_strided_slice %13 {offsets = [3, 2], sizes = [1, 27], strides = [1, 1]} : vector<4x31xf32> to vector<1x27xf32>
    %59 = vector.broadcast %57 : vector<8x1xf32> to vector<8x27xf32>
    %60 = vector.broadcast %58 : vector<1x27xf32> to vector<8x27xf32>
    %61 = arith.mulf %59, %60 : vector<8x27xf32>
    %62 = arith.addf %56, %61 : vector<8x27xf32>
    %c0_18 = arith.constant 0 : index
    %c8 = arith.constant 8 : index
    %63 = vector.load %arg2[%c0_18, %c8] : memref<8x12xf32, #tpu.memory_space<vmem>>, vector<8x1xf32>
    %64 = vector.extract_strided_slice %13 {offsets = [0, 4], sizes = [1, 27], strides = [1, 1]} : vector<4x31xf32> to vector<1x27xf32>
    %65 = vector.broadcast %63 : vector<8x1xf32> to vector<8x27xf32>
    %66 = vector.broadcast %64 : vector<1x27xf32> to vector<8x27xf32>
    %67 = arith.mulf %65, %66 : vector<8x27xf32>
    %68 = arith.addf %62, %67 : vector<8x27xf32>
    %c0_19 = arith.constant 0 : index
    %c9 = arith.constant 9 : index
    %69 = vector.load %arg2[%c0_19, %c9] : memref<8x12xf32, #tpu.memory_space<vmem>>, vector<8x1xf32>
    %70 = vector.extract_strided_slice %13 {offsets = [1, 4], sizes = [1, 27], strides = [1, 1]} : vector<4x31xf32> to vector<1x27xf32>
    %71 = vector.broadcast %69 : vector<8x1xf32> to vector<8x27xf32>
    %72 = vector.broadcast %70 : vector<1x27xf32> to vector<8x27xf32>
    %73 = arith.mulf %71, %72 : vector<8x27xf32>
    %74 = arith.addf %68, %73 : vector<8x27xf32>
    %c0_20 = arith.constant 0 : index
    %c10 = arith.constant 10 : index
    %75 = vector.load %arg2[%c0_20, %c10] : memref<8x12xf32, #tpu.memory_space<vmem>>, vector<8x1xf32>
    %76 = vector.extract_strided_slice %13 {offsets = [2, 4], sizes = [1, 27], strides = [1, 1]} : vector<4x31xf32> to vector<1x27xf32>
    %77 = vector.broadcast %75 : vector<8x1xf32> to vector<8x27xf32>
    %78 = vector.broadcast %76 : vector<1x27xf32> to vector<8x27xf32>
    %79 = arith.mulf %77, %78 : vector<8x27xf32>
    %80 = arith.addf %74, %79 : vector<8x27xf32>
    %c0_21 = arith.constant 0 : index
    %c11 = arith.constant 11 : index
    %81 = vector.load %arg2[%c0_21, %c11] : memref<8x12xf32, #tpu.memory_space<vmem>>, vector<8x1xf32>
    %82 = vector.extract_strided_slice %13 {offsets = [3, 4], sizes = [1, 27], strides = [1, 1]} : vector<4x31xf32> to vector<1x27xf32>
    %83 = vector.broadcast %81 : vector<8x1xf32> to vector<8x27xf32>
    %84 = vector.broadcast %82 : vector<1x27xf32> to vector<8x27xf32>
    %85 = arith.mulf %83, %84 : vector<8x27xf32>
    %86 = arith.addf %80, %85 : vector<8x27xf32>
    %87 = arith.index_cast %arg0 : i32 to index
    %c0_22 = arith.constant 0 : index
    %c0_23 = arith.constant 0 : index
    %88 = vector.load %arg5[%87, %c0_22, %c0_23] : memref<2x8x27xf32, #tpu.memory_space<vmem>>, vector<1x8x27xf32>
    %89 = vector.shape_cast %88 : vector<1x8x27xf32> to vector<8x27xf32>
    %90 = vector.shape_cast %86 : vector<8x27xf32> to vector<1x8x27xf32>
    tpu.vector_store %arg5[%87, %c0_22, %c0_23], %90 {strides = array<i32>} : memref<2x8x27xf32, #tpu.memory_space<vmem>>, vector<1x8x27xf32>,
    %c0_24 = arith.constant 0 : index
    %c0_25 = arith.constant 0 : index
    %91 = vector.load %arg6[%c0_24, %c0_25] : memref<8x1xf32, #tpu.memory_space<vmem>>, vector<8x1xf32>
    %cst_26 = arith.constant dense<0.000000e+00> : vector<8xf32>
    %92 = vector.multi_reduction <add>, %86, %cst_26 [1] : vector<8x27xf32> to vector<8xf32>
    %93 = vector.shape_cast %92 : vector<8xf32> to vector<8x1xf32>
    %94 = arith.addf %91, %93 : vector<8x1xf32>
    %c0_27 = arith.constant 0 : index
    %c0_28 = arith.constant 0 : index
    %95 = vector.load %arg6[%c0_27, %c0_28] : memref<8x1xf32, #tpu.memory_space<vmem>>, vector<8x1xf32>
    tpu.vector_store %arg6[%c0_27, %c0_28], %94 {strides = array<i32>} : memref<8x1xf32, #tpu.memory_space<vmem>>, vector<8x1xf32>,
    %c1_i32 = arith.constant 1 : i32
    %96 = arith.cmpi eq, %arg0, %c1_i32 : i32
    %97 = arith.extui %96 : i1 to i32
    %c0_i32_29 = arith.constant 0 : i32
    %98 = arith.cmpi ne, %97, %c0_i32_29 : i32
    scf.if %98 {
      %c0_30 = arith.constant 0 : index
      %c0_31 = arith.constant 0 : index
      %99 = vector.load %arg6[%c0_30, %c0_31] : memref<8x1xf32, #tpu.memory_space<vmem>>, vector<8x1xf32>
      %cst_32 = arith.constant 0.0185185187 : f32
      %100 = vector.broadcast %cst_32 : f32 to vector<8x1xf32>
      %101 = arith.mulf %99, %100 : vector<8x1xf32>
      %c0_33 = arith.constant 0 : index
      %c0_34 = arith.constant 0 : index
      %c0_35 = arith.constant 0 : index
      %102 = vector.load %arg5[%c0_33, %c0_34, %c0_35] : memref<2x8x27xf32, #tpu.memory_space<vmem>>, vector<2x8x27xf32>
      %103 = vector.shape_cast %101 : vector<8x1xf32> to vector<1x8x1xf32>
      %104 = vector.broadcast %103 : vector<1x8x1xf32> to vector<2x8x27xf32>
      %105 = arith.subf %102, %104 : vector<2x8x27xf32>
      %106 = arith.mulf %105, %105 : vector<2x8x27xf32>
      %cst_36 = arith.constant dense<0.000000e+00> : vector<2x8xf32>
      %107 = vector.multi_reduction <add>, %106, %cst_36 [2] : vector<2x8x27xf32> to vector<2x8xf32>
      %108 = vector.shape_cast %107 : vector<2x8xf32> to vector<2x8x1xf32>
      %cst_37 = arith.constant dense<0.000000e+00> : vector<8x1xf32>
      %109 = vector.multi_reduction <add>, %108, %cst_37 [0] : vector<2x8x1xf32> to vector<8x1xf32>
      %110 = vector.shape_cast %109 : vector<8x1xf32> to vector<1x8x1xf32>
      %cst_38 = arith.constant 0.0185185187 : f32
      %111 = vector.broadcast %cst_38 : f32 to vector<1x8x1xf32>
      %112 = arith.mulf %110, %111 : vector<1x8x1xf32>
      %cst_39 = arith.constant 0.000000e+00 : f32
      %113 = vector.broadcast %cst_39 : f32 to vector<1x8x1xf32>
      %114 = arith.maximumf %112, %113 : vector<1x8x1xf32>
      %c0_40 = arith.constant 0 : index
      %c1_41 = arith.constant 1 : index
      %115 = vector.load %arg3[%c0_40, %c1_41] : memref<8x3xf32, #tpu.memory_space<vmem>>, vector<8x1xf32>
      %116 = vector.shape_cast %115 : vector<8x1xf32> to vector<1x8x1xf32>
      %c0_42 = arith.constant 0 : index
      %c2_43 = arith.constant 2 : index
      %117 = vector.load %arg3[%c0_42, %c2_43] : memref<8x3xf32, #tpu.memory_space<vmem>>, vector<8x1xf32>
      %118 = vector.shape_cast %117 : vector<8x1xf32> to vector<1x8x1xf32>
      %cst_44 = arith.constant 9.99999974E-6 : f32
      %119 = vector.broadcast %cst_44 : f32 to vector<1x8x1xf32>
      %120 = arith.addf %114, %119 : vector<1x8x1xf32>
      %121 = math.rsqrt %120 : vector<1x8x1xf32>
      %122 = arith.mulf %116, %121 : vector<1x8x1xf32>
      %123 = vector.broadcast %122 : vector<1x8x1xf32> to vector<2x8x27xf32>
      %124 = arith.mulf %105, %123 : vector<2x8x27xf32>
      %125 = vector.broadcast %118 : vector<1x8x1xf32> to vector<2x8x27xf32>
      %126 = arith.addf %124, %125 : vector<2x8x27xf32>
      %cst_45 = arith.constant 0.000000e+00 : f32
      %127 = vector.broadcast %cst_45 : f32 to vector<2x8x27xf32>
      %128 = arith.maximumf %126, %127 : vector<2x8x27xf32>
      %c0_46 = arith.constant 0 : index
      %c0_47 = arith.constant 0 : index
      %c0_48 = arith.constant 0 : index
      %129 = vector.load %arg4[%c0_46, %c0_47, %c0_48] : memref<2x8x27xf32, #tpu.memory_space<vmem>>, vector<2x8x27xf32>
      tpu.vector_store %arg4[%c0_46, %c0_47, %c0_48], %128 {strides = array<i32>} : memref<2x8x27xf32, #tpu.memory_space<vmem>>, vector<2x8x27xf32>,
    } else {
    }
    return
  }
  func.func @transform_0(%arg0: i32) -> (i32, i32, i32, i32) {
    %c0_i32 = arith.constant 0 : i32
    %c0_i32_0 = arith.constant 0 : i32
    %c0_i32_1 = arith.constant 0 : i32
    %c0_i32_2 = arith.constant 0 : i32
    return %arg0, %c0_i32, %c0_i32_0, %c0_i32_1 : i32, i32, i32, i32
  }
  func.func @transform_1(%arg0: i32) -> (i32, i32) {
    %c0_i32 = arith.constant 0 : i32
    %c0_i32_0 = arith.constant 0 : i32
    %c0_i32_1 = arith.constant 0 : i32
    return %c0_i32, %c0_i32_0 : i32, i32
  }
  func.func @transform_2(%arg0: i32) -> (i32, i32) {
    %c0_i32 = arith.constant 0 : i32
    %c0_i32_0 = arith.constant 0 : i32
    %c0_i32_1 = arith.constant 0 : i32
    return %c0_i32, %c0_i32_0 : i32, i32
  }
  func.func @transform_3(%arg0: i32) -> (i32, i32, i32) {
    %c0_i32 = arith.constant 0 : i32
    %c0_i32_0 = arith.constant 0 : i32
    %c0_i32_1 = arith.constant 0 : i32
    %c0_i32_2 = arith.constant 0 : i32
    return %c0_i32, %c0_i32_0, %c0_i32_1 : i32, i32, i32
  }
}

</mosaic_0001>

<bundles_post_ra>
// kernel: tpu_custom_call.1
= control target key start
LH: loop header
LB: loop body
LE: loop exit
PB: predicated region body
PF: predicated region fallthrough
CT: control target
= control target key end

     0   :  { %8 = vsyncpa [#allocation5], 0  ;;  %s795_s0 = inlined_call_operand.hbm [shape: f32[2,2,4,32], index: 0, kind: input, shape index: {}]   ;;  %s796_s1 = inlined_call_operand.vmem [shape: f32[8,12], index: 1, kind: input, shape index: {}]   ;;  %s797_s2 = inlined_call_operand.vmem [shape: f32[8,3], index: 2, kind: input, shape index: {}]   ;;  %s798_s3 = inlined_call_operand.hbm [shape: f32[2,8,27], index: 3, kind: output, shape index: {}]  }
   0x1   :  { %10 = vsyncpa [#allocation5 + $0x1], 0 }
   0x2   :  { %11 = vsyncpa [#allocation6], 0  ;;  %s682_s12 = smov 0   ;;  %s684_s13 = smov 0  }
   0x3   :  { %s686_s14 = smov 0   ;;  %s688_s15 = smov 0  }
   0x4 LB: > { %s701_s16 = sadd.s32 4294967295, %s636_s15   ;;  %s704_s17 = sadd.s32 1, %s636_s15   ;;  %s636_s15 = sphi %s688_s15, %s805_s15   ;;  %s632_s14 = sphi %s686_s14, %s804_s14   ;;  %s628_s13 = sphi %s684_s13, %s803_s13   ;;  %s624_s12 = sphi %s682_s12, %s802_s12  }
   0x5   : > { %s21_s18 = ssub.s32 %s636_s15, %s704_s17  ;;  %s24_s19 = sadd.s32 1, %s632_s14 }
   0x6   : > { %p22_p0 = scmp.eq.s32.totalorder %s21_s18, 0  ;;  %p31_p1 = scmp.ne.s32.totalorder %s632_s14, %s628_s13 }
   0x7   : > { %p32_p2 = scmp.eq.s32.totalorder %s636_s15, 0  ;;  %p37_p3 = scmp.ne.s32.totalorder %s628_s13, %s624_s12 }
   0x8   : > { %s714_s20 = scalar_select %p22_p0, %s632_s14, %s24_s19  }
   0x9   : > { %p716_p4 = por %p32_p2, %p31_p1  ;;  %p38_p5 = scmp.eq.s32.totalorder %s701_s16, 0 }
   0xa   : > { %p463_p6 = scmp.lt.s32.totalorder %s636_s15, 2  ;;  %s130_s23 = sand.u32 1, %s632_s14  }
   0xb   : > { %p722_p7 = por %p38_p5, %p37_p3  ;;  %s439_s24 = sshll.u32 %s130_s23, 3 }
   0xc   : > { %s452_s25 = sshll.u32 %s636_s15, 3  ;;  %s134_s29 = scalar_lea.vmem [#allocation4], %s439_s24 }
   0xd   : > { %s139_s28 = scalar_lea.hbm %s795_s0, %s452_s25  ;;  %s142_s30 = sshll.u32 %s134_s29, 4  ;;  %s143_s30 = int_to_ptr.vmem [resolvable:$true] %s142_s30 }
   0xe   : > { %s140_s4 = sshll.u32 %s139_s28, 4  ;;  %p733_p8 = pnand %p463_p6, %p716_p4  ;;  %s141_s4 = int_to_ptr.hbm [resolvable:$true] %s140_s4 }
   0xf   : > { %p442_p9 = scmp.ge.s32.totalorder %s636_s15, 1  ;;  %s131_s6 = scalar_lea.sflag [#allocation5], %s130_s23 }
  0x10   : > { %s540_s7 = sshra.s32 %s141_s4, 4  ;;  %p544_p11 = pneg %p733_p8  ;;  %s541_s7 = int_to_ptr.hbm [resolvable:$true] %s540_s7 }
  0x11   : > { %s542_s8 = scalar_lea.hbm %s541_s7, 8  ;;  %s547_s11 = scalar_lea.hbm %s795_s0, 16 }
  0x12   : > { %p543_p10 = scmp.ne.s32.totalorder %s541_s7, %s542_s8  ;;  %p548_p0 = scmp.lt.s32.totalorder %s541_s7, %s795_s0 }
  0x13   : > { %p549_p1 = scmp.lt.s32.totalorder %s547_s11, %s542_s8 }
  0x14   : > { %p545_p12 = pnand %p544_p11, %p543_p10 }
  0x15   : > { %p550_p2 = por %p549_p1, %p548_p0 }
  0x16   : > { %p546_p13 = pneg %p545_p12 }
  0x18   : > { %p551_p3 = pnand %p550_p2, %p546_p13 }
  0x1a   : > { %554 = shalt.err (!%p551_p3)
}
  0x1b   : > { %s638_s19 = smov 64   ;;  %s639_s21 = smov 4  }
  0x1c   : > { %462 = dma.hbm_to_vmem [thread:$0]  (!%p733_p8), %s141_s4, 128, %s143_s30, %s131_s6, %s638_s19, %s638_s19, %s639_s21  }
  0x1d   : > { %p150_p4 = scmp.lt.s32.totalorder %s636_s15, 3 }
  0x1f   : > { %p151_p5 = pnand %p442_p9, %p150_p4 }
  0x20   : > { %s156_s23 = sand.u32 (!%p151_p5), 1, %s628_s13  }
  0x21   : > { %154 = sbr.rel (%p151_p5) target bundleno = 832 (0x340), region = 32  ;;  %s752_s24 = sshll.u32 (!%p151_p5), %s156_s23, 3 }
  0x22   : > { %s157_s25 = scalar_lea.sflag (!%p151_p5), [#allocation5], %s156_s23  ;;  %s160_s26 = scalar_lea.vmem (!%p151_p5), [#allocation4], %s752_s24 }
  0x26   : > { %615 = dma.done.wait (%p722_p7), %s157_s25, 128  }
  0x27   : > { %617 = vsyncadd (%p722_p7), %s157_s25, 4294967168  ;;  %p444_p6 = scmp.ne.s32.totalorder %s701_s16, 0 }
  0x29   : > { %182 = sbr.rel (%p444_p6) target bundleno = 48 (0x30), region = 40 }
  0x2e   : > { %vm183_vm0 = vcmask 7168   ;;  %v640_v0 = vmov 0.0  }
  0x2f   : > { %184 = vst.msk [vmem:[#allocation3] sm:$0xff] %vm183_vm0, %v640_v0 }
  0x30 PF: > { %v185_v1 = vld [vmem:[%s160_s26] sm:$0xf]  ;;  %v641_v2 = vmov 7   ;;  %v642_v3 = vmov 5   ;;  %s643_s22 = smov 127   ;;  %v644_v5 = vmov 4  }
  0x31   : > { %525 = vset.pattern.permute.xlu2 %v641_v2  ;;  %523 = vset.pattern.permute.xlu1 %v642_v3  ;;  %v195_v4 = vld [vmem:[%s796_s1] sm:$0xff]  ;;  %v645_v6 = vmov 8   ;;  %v646_v7 = vmov 6   ;;  %v647_v8 = vmov 11   ;;  %v648_v9 = vmov 10   ;;  %s654_s28 = smov 126  }
  0x32   : > { %190 = vrot.lane.b32.xlu0 %v185_v1, %s643_s22  ;;  %256 = vperm.xlu2 %525, %v195_v4   ;;  %v649_v10 = vmov 9   ;;  %v650_v11 = vmov 1   ;;  %v651_v12 = vmov 0   ;;  %v652_v13 = vmov 3   ;;  %v445_v15 = vld [vmem:[%s160_s26 + $0x4] sm:$0xf] }
  0x33   : > { %236 = vperm.xlu1 %523, %v195_v4   ;;  %522 = vset.pattern.permute.xlu0 %v644_v5  ;;  %v653_v14 = vmov 2   ;;  %v188_v17 = vadd.f32 %v445_v15, %v185_v1  ;;  %s655_s29 = smov 124   ;;  %s446_s30 = sshll.u32 %s701_s16, 3  ;;  %vm307_vm1 = vcmask 220160   ;;  %vm314_vm2 = vcmask 7168  }
  0x34   : > { %s306_s4 = scalar_lea.vmem [#allocation2], %s446_s30  ;;  %p447_p7 = scmp.ne.s32.totalorder %s701_s16, 1 }
  0x3a   : > { %226 = vperm.xlu0 %522, %v195_v4   ;;  %526 = vset.pattern.permute.xlu2 %v645_v6 }
  0x3b   : > { %524 = vset.pattern.permute.xlu1 %v646_v7  ;;  %266 = vperm.xlu2 %526, %v195_v4  }
  0x3c   : > { %246 = vperm.xlu1 %524, %v195_v4  }
  0x42   : > { %529 = vset.pattern.permute.xlu0 %v647_v8 }
  0x43   : > { %296 = vperm.xlu0 %529, %v195_v4   ;;  %528 = vset.pattern.permute.xlu2 %v648_v9 }
  0x44   : > { %527 = vset.pattern.permute.xlu1 %v649_v10  ;;  %286 = vperm.xlu2 %528, %v195_v4  }
  0x45   : > { %276 = vperm.xlu1 %527, %v195_v4  }
  0x4c   : > { %531 = vset.pattern.permute.xlu2 %v650_v11 }
  0x4d   : > { %530 = vset.pattern.permute.xlu1 %v651_v12  ;;  %205 = vperm.xlu2 %531, %v195_v4  }
  0x4e   : > { %198 = vperm.xlu1 %530, %v195_v4  }
  0x55   : > { %533 = vset.pattern.permute.xlu2 %v652_v13 }
  0x56   : > { %532 = vset.pattern.permute.xlu1 %v653_v14  ;;  %219 = vperm.xlu2 %533, %v195_v4  }
  0x57   : > { %212 = vperm.xlu1 %532, %v195_v4   ;;  %v309_v4 = vld [vmem:[#allocation3] sm:$0xff] }
  0x8c   : > { %v257_v16 = vpop.permute.xlu2 %256 }
  0x95   : > { %v267_v23 = vpop.permute.xlu2 %266 }
  0x9e   : > { %v287_v33 = vpop.permute.xlu2 %286 }
  0xa4   : > { %v191_v18 = vpop.permute.xlu0 %190 }
  0xa5   : > { %v193_v19 = vadd.f32 %v191_v18, %v188_v17  ;;  %v237_v20 = vpop.permute.xlu1 %236 }
  0xa7   : > { %v194_v21 = vmul.f32 0.33333334, %v193_v19  ;;  %v206_v40 = vpop.permute.xlu2 %205 }
  0xa9   : > { %v208_v22 = vperm.slane %v194_v21, 1  ;;  %v201_v25 = vperm.slane %v194_v21, 0  ;;  %v215_v28 = vperm.slane %v194_v21, 2  ;;  %v222_v31 = vperm.slane %v194_v21, 3 }
  0xab   : > { %v239_v24 = vmul.f32 %v237_v20, %v208_v22  ;;  %v269_v32 = vmul.f32 %v267_v23, %v201_v25  ;;  %v259_v34 = vmul.f32 %v257_v16, %v222_v31  ;;  %v289_v39 = vmul.f32 %v287_v33, %v215_v28 }
  0xac   : > { %v227_v26 = vpop.permute.xlu0 %226  ;;  %v209_v42 = vmul.f32 %v208_v22, %v206_v40 }
  0xad   : > { %v229_v27 = vmul.f32 %v227_v26, %v201_v25  ;;  %241 = vrot.lane.b32.xlu1 %v239_v24, %s654_s28 }
  0xae   : > { %v247_v29 = vpop.permute.xlu1 %246 }
  0xaf   : > { %v249_v30 = vmul.f32 %v247_v29, %v215_v28  ;;  %231 = vrot.lane.b32.xlu0 %v229_v27, %s654_s28 }
  0xb0   : > { %v220_v45 = vpop.permute.xlu2 %219 }
  0xb1   : > { %251 = vrot.lane.b32.xlu2 %v249_v30, %s654_s28  ;;  %v223_v48 = vmul.f32 %v222_v31, %v220_v45 }
  0xb5   : > { %271 = vrot.lane.b32.xlu1 %v269_v32, %s655_s29  ;;  %v297_v36 = vpop.permute.xlu0 %296 }
  0xb6   : > { %v299_v38 = vmul.f32 %v297_v36, %v222_v31 }
  0xb7   : > { %v277_v35 = vpop.permute.xlu1 %276  ;;  %261 = vrot.lane.b32.xlu0 %v259_v34, %s654_s28 }
  0xb8   : > { %v279_v37 = vmul.f32 %v277_v35, %v208_v22 }
  0xba   : > { %281 = vrot.lane.b32.xlu2 %v279_v37, %s655_s29 }
  0xbd   : > { %301 = vrot.lane.b32.xlu1 %v299_v38, %s655_s29 }
  0xbf   : > { %291 = vrot.lane.b32.xlu0 %v289_v39, %s655_s29 }
  0xc0   : > { %v199_v41 = vpop.permute.xlu1 %198 }
  0xc1   : > { %v202_v43 = vmul.f32 %v201_v25, %v199_v41 }
  0xc3   : > { %v210_v44 = vadd.f32 %v209_v42, %v202_v43 }
  0xc9   : > { %v213_v46 = vpop.permute.xlu1 %212 }
  0xca   : > { %v216_v47 = vmul.f32 %v215_v28, %v213_v46 }
  0xcc   : > { %v217_v49 = vadd.f32 %v216_v47, %v210_v44 }
  0xce   : > { %v224_v50 = vadd.f32 %v223_v48, %v217_v49 }
 0x10b   : > { %v252_v55 = vpop.permute.xlu2 %251 }
 0x114   : > { %v282_v61 = vpop.permute.xlu2 %281 }
 0x11f   : > { %v242_v51 = vpop.permute.xlu1 %241 }
 0x121   : > { %v232_v52 = vpop.permute.xlu0 %231 }
 0x122   : > { %v234_v53 = vadd.f32 %v232_v52, %v224_v50 }
 0x124   : > { %v244_v54 = vadd.f32 %v242_v51, %v234_v53 }
 0x126   : > { %v254_v56 = vadd.f32 %v252_v55, %v244_v54 }
 0x127   : > { %v272_v57 = vpop.permute.xlu1 %271 }
 0x129   : > { %v262_v58 = vpop.permute.xlu0 %261 }
 0x12a   : > { %v264_v59 = vadd.f32 %v262_v58, %v254_v56 }
 0x12c   : > { %v274_v60 = vadd.f32 %v272_v57, %v264_v59 }
 0x12e   : > { %v284_v62 = vadd.f32 %v282_v61, %v274_v60 }
 0x12f   : > { %v302_v1 = vpop.permute.xlu1 %301 }
 0x131   : > { %v292_v63 = vpop.permute.xlu0 %291 }
 0x132   : > { %v294_v0 = vadd.f32 %v292_v63, %v284_v62 }
 0x134   : > { %v304_v2 = vadd.f32 %v302_v1, %v294_v0 }
 0x136   : > { %v310_v3 = vsel %vm307_vm1, %v304_v2, 0.0  ;;  %308 = vst.msk [vmem:[%s306_s4] sm:$0xff] %vm307_vm1, %v304_v2 }
 0x137   : > { %311 = vadd.xlane.f32.xlu2 %v310_v3 }
 0x1a9   : > { %319 = sbr.rel (%p447_p7) target bundleno = 826 (0x33a), region = 44 }
 0x1aa   : > { %v312_v5 = vpop.xlane.xlu2 %311 }
 0x1ab   : > { %v313_v6 = vadd.f32 %v312_v5, %v309_v4 }
 0x1ad   : > { %315 = vst.msk [vmem:[#allocation3] sm:$0xff] %vm314_vm2, %v313_v6 }
 0x1ae   : > { %v656_v8 = vmov 0   ;;  %v322_v10 = vld [vmem:[#allocation2] sm:$0xff]  ;;  %v323_v11 = vld [vmem:[#allocation2 + $0x8] sm:$0xff]  ;;  %v657_v19 = vmov 1   ;;  %v658_v21 = vmov 2  }
 0x1af   : > { %534 = vset.pattern.permute.xlu0 %v656_v8  ;;  %535 = vset.pattern.permute.xlu1 %v657_v19  ;;  %v342_v20 = vld [vmem:[%s797_s2] sm:$0xff] }
 0x1b0   : > { %536 = vset.pattern.permute.xlu2 %v658_v21 }
 0x1b1   : > { %364 = vperm.xlu2 %536, %v342_v20  }
 0x1b4   : > { %v320_v7 = vld [vmem:[#allocation3] sm:$0xff] }
 0x1b5   : > { %v321_v9 = vmul.f32 0.018518519, %v320_v7 }
 0x1b7   : > { %326 = vperm.xlu0 %534, %v321_v9  }
 0x1bf   : > { %537 = vset.pattern.permute.xlu0 %v658_v21 }
 0x20b   : > { %v365_v37 = vpop.permute.xlu2 %364 }
 0x229   : > { %v327_v12 = vpop.permute.xlu0 %326 }
 0x22a   : > { %v329_v13 = vsub.f32 %v322_v10, %v327_v12  ;;  %v330_v14 = vsub.f32 %v323_v11, %v327_v12 }
 0x22c   : > { %v332_v15 = vmul.f32 %v330_v14, %v330_v14  ;;  %v331_v16 = vmul.f32 %v329_v13, %v329_v13 }
 0x22e   : > { %v336_v17 = vsel %vm307_vm1, %v332_v15, 0.0  ;;  %v333_v18 = vsel %vm307_vm1, %v331_v16, 0.0 }
 0x22f   : > { %337 = vadd.xlane.f32.xlu1 %v336_v17  ;;  %334 = vadd.xlane.f32.xlu0 %v333_v18 }
 0x2a2   : > { %v338_v22 = vpop.xlane.xlu1 %337  ;;  %v335_v23 = vpop.xlane.xlu0 %334 }
 0x2a3   : > { %v339_v24 = vadd.f32 %v338_v22, %v335_v23 }
 0x2a5   : > { %v340_v25 = vmul.f32 0.018518519, %v339_v24 }
 0x2a7   : > { %v341_v26 = vmax.f32 %v340_v25, 0.0 }
 0x2a9   : > { %v343_v27 = vadd.f32 1e-05, %v341_v26 }
 0x2ab   : > { %538 = vrsqrt.f32 %v343_v27  ;;  %vm350_vm4 = vweird.f32 %v343_v27 }
 0x2b1   : > { %v539_v28 = vpop.eup %538 }
 0x2b2   : > { %v345_v29 = vmul.f32 %v539_v28, %v343_v27  ;;  %vm351_vm3 = vweird.f32 %v539_v28 }
 0x2b3   : > { %vm352_vm5 = vmor %vm350_vm4, %vm351_vm3 }
 0x2b4   : > { %v346_v30 = vmul.f32 %v539_v28, %v345_v29 }
 0x2b6   : > { %v347_v31 = vmul.f32 0.5, %v346_v30 }
 0x2b8   : > { %v348_v32 = vsub.f32 1.5, %v347_v31 }
 0x2ba   : > { %v349_v33 = vmul.f32 %v539_v28, %v348_v32 }
 0x2bc   : > { %v353_v34 = vsel %vm352_vm5, %v539_v28, %v349_v33 }
 0x2bd   : > { %v354_v35 = vmul.f32 %v353_v34, %v342_v20 }
 0x2bf   : > { %357 = vperm.xlu1 %535, %v354_v35  }
 0x331   : > { %v358_v36 = vpop.permute.xlu1 %357 }
 0x332   : > { %v360_v38 = vmul.f32 %v358_v36, %v329_v13  ;;  %v361_v39 = vmul.f32 %v358_v36, %v330_v14 }
 0x334   : > { %v367_v40 = vadd.f32 %v365_v37, %v360_v38  ;;  %v368_v41 = vadd.f32 %v365_v37, %v361_v39 }
 0x336   : > { %v369_v42 = vmax.f32 %v367_v40, 0.0  ;;  %v370_v43 = vmax.f32 %v368_v41, 0.0 }
 0x338   : > { %371 = vst.msk [vmem:[#allocation7] sm:$0xff] %vm307_vm1, %v369_v42 }
 0x339   : > { %372 = vst.msk [vmem:[#allocation7 + $0x8] sm:$0xff] %vm307_vm1, %v370_v43 }
 0x33a PF: > { %p464_p8 = scmp.eq.s32.totalorder %s701_s16, 1  ;;  %s659_s7 = smov [#allocation7]  }
 0x33b   : > { %s378_s8 = sshll.u32 %s659_s7, 4  ;;  %s380_s11 = sshll.u32 %s798_s3, 4  ;;  %s379_s8 = int_to_ptr.vmem [resolvable:$true] %s378_s8  ;;  %s381_s11 = int_to_ptr.hbm [resolvable:$true] %s380_s11 }
 0x33c   : > { %s660_s12 = smov 128   ;;  %s661_s18 = smov 8  }
 0x33d   : > { %456 = dma.vmem_to_hbm [thread:$0]  (%p464_p8), %s379_s8, 256, %s381_s11, [#allocation6], %s660_s12, %s660_s12, %s661_s18  }
 0x33e   : > { %619 = dma.done.wait (%p464_p8), [#allocation6], 256  }
 0x33f   : > { %621 = vsyncadd (%p464_p8), [#allocation6], 4294967040 }
 0x340 PF: > { %p14_p9 = scmp.ge.s32.totalorder %s704_s17, 4   ;;  %s802_s12 = smov %s628_s13 }
 0x341   : > { %s803_s13 = smov %s632_s14  ;;  %s804_s14 = smov %s714_s20 }
 0x342   : > { %s805_s15 = smov %s704_s17  ;;  %16 = sbr.rel (!%p14_p9) target bundleno = 4 (0x4), region = 79 }
 0x347   :  { %397 = vsyncpa [#allocation5], 1 }
 0x348   :  { %399 = vsyncpa [#allocation5 + $0x1], 1 }
 0x349   :  { %400 = vsyncpa [#allocation6], 1 }
 0x34a   :  { %402 = vsyncpa [#allocation6 + $0x1], 1 }

</bundles_post_ra>
